<compile_context>
chip_gen: v6e
topology: v6e:2x2x1
jax: 0.10.0
libtpu: 0.0.40
codegen_flags: <defaults>
</compile_context>

<pallas_src>
import math

import jax
import jax.numpy as jnp
from jax.experimental import pallas as pl
from jax.experimental.pallas import tpu as pltpu


def _make_kernel(h, hp, w, wp, th):
    """Per-(row-block, image, channel) kernel body (closes over static dims)."""
    pad_w = wp - w
    # Bottom padding exists => the single boundary row-block needs row masking.
    # Row-blocks never lie entirely inside the padding because TH is a multiple
    # of size_divisibility (see _pick_row_tile), so this is the only mask.
    apply_row_mask = hp > h

    def kernel(mean_ref, inv_std_ref, x_ref, o_ref):
        # mean_ref / inv_std_ref: SMEM (C,)  ;  x_ref: VMEM (TH, W)  ;  o_ref: VMEM (TH, Wp)
        r = pl.program_id(0)          # row block
        c = pl.program_id(2)          # channel
        mean = mean_ref[c]
        inv_std = inv_std_ref[c]

        # Normalize the (TH, W) tile.  For the boundary block the input window
        # extends past H; those rows hold unspecified VMEM contents, which is
        # benign: jnp.where below selects elementwise, so NaN/Inf garbage in the
        # masked-out rows never reaches the output.
        norm = (x_ref[...] - mean) * inv_std

        if pad_w > 0:                 # right zero-pad, built in-register so the
            norm = jnp.concatenate(   # store below is one unmasked full-width vst
                [norm, jnp.zeros((th, pad_w), dtype=norm.dtype)], axis=-1)

        if apply_row_mask:            # zero rows >= H (bottom padding)
            rows = jax.lax.broadcasted_iota(jnp.int32, (th, wp), 0) + r * th
            norm = jnp.where(rows < h, norm, jnp.zeros_like(norm))

        o_ref[...] = norm.astype(o_ref.dtype)   # single lane-dense store

    return kernel


def _pick_row_tile(h, hp, w, wp, itemsize, size_div, vmem_capacity_bytes,
                   max_block_rows=None):
    """Row-block height TH.

    Constraints:
      * multiple of the dtype sublane tile (8 f32 / 16 bf16 / 32 int8) so
        stores stay unmasked and natively packed;
      * multiple of size_divisibility so no row block lies entirely in the
        bottom padding (=> plain input index_map, no pad-only branch);
      * per-step live block bytes fit a per-generation budget
        <= min(8 MiB, physical_vmem/8), so double-buffering never collides
        with v5e's 16 MiB default scoped limit nor v7x's 32-of-64 MiB;
      * capped at 512 rows (>=512-row tiles already sit at ~85% of the HBM
        roofline; larger buys ~1%).
    """
    del h  # TH may exceed H; the boundary mask handles the ragged read.
    sublane = max(8, 32 // max(itemsize, 1))
    sd = max(1, size_div)
    step = sublane * sd // math.gcd(sublane, sd)        # lcm(sublane, size_div)

    budget_bytes = min(8 << 20, vmem_capacity_bytes // 8)
    row_bytes = (w + wp) * itemsize
    budget_rows = max(step, budget_bytes // max(row_bytes, 1))

    cap = 512
    if max_block_rows is not None:
        cap = min(cap, max_block_rows)

    th = min(budget_rows, cap, hp)
    th = max(step, (th // step) * step)                 # round down to a multiple of step
    if th > hp:
        th = hp                                         # tiny image: one full-height block
    return th


def normalize_and_pad(images, pixel_mean, pixel_std, size_divisibility,
                      *, max_block_rows=None):
    """(x - mean) * (1/std) per channel, then zero-pad H/W up to size_divisibility.

    images: (N, C, H, W);  pixel_mean, pixel_std: (C,)
    returns: (N, C, Hp, Wp) with Hp/Wp rounded up to size_divisibility.
    """
    n, c, h, w = images.shape
    sd = max(1, int(size_divisibility))
    hp = -(-h // sd) * sd
    wp = -(-w // sd) * sd
    itemsize = jnp.dtype(images.dtype).itemsize

    try:
        vmem_cap = int(pltpu.get_tpu_info().vmem_capacity_bytes)
    except Exception:
        vmem_cap = 64 << 20                 # conservative fallback (v7x per-TC)

    th = _pick_row_tile(h, hp, w, wp, itemsize, sd, vmem_cap, max_block_rows)
    nrb = -(-hp // th)                      # row blocks (last one may be ragged)

    mean = pixel_mean.astype(images.dtype)
    inv_std = (1.0 / pixel_std).astype(images.dtype)    # divide -> reciprocal-multiply

    # Scoped-VMEM request: actual double-buffered in+out block bytes + headroom
    # for Mosaic internal scratch, floored at the smallest per-generation default.
    block_bytes = th * (w + wp) * itemsize
    vmem_limit = max(16 << 20, 2 * block_bytes + (4 << 20))
    vmem_limit = min(vmem_limit, vmem_cap)

    cost = pl.CostEstimate(
        flops=2 * n * c * h * w,
        transcendentals=0,
        bytes_accessed=n * c * (h * w + hp * wp) * itemsize,
    )

    return pl.pallas_call(
        _make_kernel(h, hp, w, wp, th),
        out_shape=jax.ShapeDtypeStruct((n, c, hp, wp), images.dtype),
        grid_spec=pl.GridSpec(
            # Row blocks lead so the v7x megacore split stays balanced even when
            # N and C are tiny; every block is written exactly once => all parallel.
            grid=(nrb, n, c),
            in_specs=[
                pl.BlockSpec(memory_space=pltpu.MemorySpace.SMEM),   # pixel_mean
                pl.BlockSpec(memory_space=pltpu.MemorySpace.SMEM),   # 1 / pixel_std
                pl.BlockSpec((None, None, th, w), lambda r, i, j: (i, j, r, 0)),
            ],
            out_specs=pl.BlockSpec((None, None, th, wp),
                                   lambda r, i, j: (i, j, r, 0)),
        ),
        compiler_params=pltpu.CompilerParams(
            dimension_semantics=("parallel", "parallel", "parallel"),
            vmem_limit_bytes=int(vmem_limit),
        ),
        cost_estimate=cost,
    )(mean, inv_std, images)


# TODO(synk): backbone(images.tensor), proposal_generator(...) and
# detector_postprocess(...) are registry-built submodules not defined in this
# module; no Pallas translation is possible without their concrete definitions.


def _reference(images, pixel_mean, pixel_std, size_divisibility):
    n, c, h, w = images.shape
    sd = max(1, int(size_divisibility))
    hp = -(-h // sd) * sd
    wp = -(-w // sd) * sd
    ref = (images - pixel_mean[None, :, None, None]) / pixel_std[None, :, None, None]
    return jnp.pad(ref, ((0, 0), (0, 0), (0, hp - h), (0, wp - w)))


if __name__ == "__main__":
    key = jax.random.PRNGKey(0)
    k1, k2, k3 = jax.random.split(key, 3)

    # Deterministic "cfg.MODEL.PIXEL_MEAN / PIXEL_STD" (detectron2 defaults).
    pixel_mean = jnp.array([103.530, 116.280, 123.675], dtype=jnp.float32)
    pixel_std = jnp.array([57.375, 57.120, 58.395], dtype=jnp.float32)
    SIZE_DIVISIBILITY = 32   # typical FPN backbone size_divisibility

    tests = [
        # (key, N, C, H, W, max_block_rows)
        (k1, 2, 3, 16, 16, None),   # H, W < size_divisibility (heavy padding)
        (k2, 2, 3, 40, 48, None),   # ragged boundary block (H % TH != 0)
        (k3, 1, 3, 80, 40, 32),     # multiple row blocks: interior + boundary
    ]

    for kk, n, c, h, w, mbr in tests:
        images = jax.random.uniform(kk, (n, c, h, w), jnp.float32, 0.0, 255.0)
        out = normalize_and_pad(images, pixel_mean, pixel_std,
                                SIZE_DIVISIBILITY, max_block_rows=mbr)
        out = jax.block_until_ready(out)
        ref = _reference(images, pixel_mean, pixel_std, SIZE_DIVISIBILITY)
        assert out.shape == ref.shape, (out.shape, ref.shape)
        assert jnp.allclose(out, ref, atol=1e-5, rtol=1e-5)

    print("KERNEL_OK")
</pallas_src>

<mosaic_0001>
module attributes {stable_mosaic.version = 11 : i64} {
  func.func @kernel(%arg0: i32, %arg1: i32, %arg2: i32, %arg3: memref<3xf32, #tpu.memory_space<smem>>, %arg4: memref<3xf32, #tpu.memory_space<smem>>, %arg5: memref<1x1x32x16xf32, #tpu.memory_space<vmem>>, %arg6: memref<1x1x32x32xf32, #tpu.memory_space<vmem>>) attributes {dimension_semantics = [#tpu.dimension_semantics<parallel>, #tpu.dimension_semantics<parallel>, #tpu.dimension_semantics<parallel>], iteration_bounds = array<i64: 1, 2, 3>, scalar_prefetch = 0 : i64, scratch_operands = 0 : i64, tpu.core_type = #tpu.core_type<tc>, window_params = [{transform_indices = @transform_0, window_bounds = array<i64: 3>}, {transform_indices = @transform_1, window_bounds = array<i64: 3>}, {transform_indices = @transform_2, window_bounds = array<i64: 1, 1, 32, 16>}, {transform_indices = @transform_3, window_bounds = array<i64: 1, 1, 32, 32>}]} {
    %0 = arith.index_cast %arg2 : i32 to index
    %1 = memref.load %arg3[%0] : memref<3xf32, #tpu.memory_space<smem>>
    %2 = arith.index_cast %arg2 : i32 to index
    %3 = memref.load %arg4[%2] : memref<3xf32, #tpu.memory_space<smem>>
    %c0 = arith.constant 0 : index
    %c0_0 = arith.constant 0 : index
    %c0_1 = arith.constant 0 : index
    %c0_2 = arith.constant 0 : index
    %4 = vector.load %arg5[%c0, %c0_0, %c0_1, %c0_2] : memref<1x1x32x16xf32, #tpu.memory_space<vmem>>, vector<1x1x32x16xf32>
    %5 = vector.shape_cast %4 : vector<1x1x32x16xf32> to vector<32x16xf32>
    %6 = vector.broadcast %1 : f32 to vector<32x16xf32>
    %7 = arith.subf %5, %6 : vector<32x16xf32>
    %8 = vector.broadcast %3 : f32 to vector<32x16xf32>
    %9 = arith.mulf %7, %8 : vector<32x16xf32>
    %cst = arith.constant 0.000000e+00 : f32
    %10 = vector.broadcast %cst : f32 to vector<32x16xf32>
    %11 = tpu.concatenate %9, %10 in 1 : vector<32x16xf32>, vector<32x16xf32> -> vector<32x32xf32>
    %12 = tpu.iota {dimensions = array<i32: 0>} : vector<32x32xi32>
    %c32_i32 = arith.constant 32 : i32
    %13 = arith.muli %arg0, %c32_i32 : i32
    %14 = vector.broadcast %13 : i32 to vector<32x32xi32>
    %15 = arith.addi %12, %14 : vector<32x32xi32>
    %c16_i32 = arith.constant 16 : i32
    %16 = vector.broadcast %c16_i32 : i32 to vector<32x32xi32>
    %17 = arith.cmpi slt, %15, %16 : vector<32x32xi32>
    %cst_3 = arith.constant 0.000000e+00 : f32
    %18 = vector.broadcast %cst_3 : f32 to vector<32x32xf32>
    %19 = arith.select %17, %11, %18 : vector<32x32xi1>, vector<32x32xf32>
    %c0_4 = arith.constant 0 : index
    %c0_5 = arith.constant 0 : index
    %c0_6 = arith.constant 0 : index
    %c0_7 = arith.constant 0 : index
    %20 = vector.load %arg6[%c0_4, %c0_5, %c0_6, %c0_7] : memref<1x1x32x32xf32, #tpu.memory_space<vmem>>, vector<1x1x32x32xf32>
    %21 = vector.shape_cast %20 : vector<1x1x32x32xf32> to vector<32x32xf32>
    %22 = vector.shape_cast %19 : vector<32x32xf32> to vector<1x1x32x32xf32>
    tpu.vector_store %arg6[%c0_4, %c0_5, %c0_6, %c0_7], %22 {strides = array<i32>} : memref<1x1x32x32xf32, #tpu.memory_space<vmem>>, vector<1x1x32x32xf32>,
    return
  }
  func.func @transform_0(%arg0: i32, %arg1: i32, %arg2: i32) -> i32 {
    %c0_i32 = arith.constant 0 : i32
    %c0_i32_0 = arith.constant 0 : i32
    return %c0_i32 : i32
  }
  func.func @transform_1(%arg0: i32, %arg1: i32, %arg2: i32) -> i32 {
    %c0_i32 = arith.constant 0 : i32
    %c0_i32_0 = arith.constant 0 : i32
    return %c0_i32 : i32
  }
  func.func @transform_2(%arg0: i32, %arg1: i32, %arg2: i32) -> (i32, i32, i32, i32) {
    %c0_i32 = arith.constant 0 : i32
    %c0_i32_0 = arith.constant 0 : i32
    return %arg1, %arg2, %arg0, %c0_i32 : i32, i32, i32, i32
  }
  func.func @transform_3(%arg0: i32, %arg1: i32, %arg2: i32) -> (i32, i32, i32, i32) {
    %c0_i32 = arith.constant 0 : i32
    %c0_i32_0 = arith.constant 0 : i32
    return %arg1, %arg2, %arg0, %c0_i32 : i32, i32, i32, i32
  }
}

</mosaic_0001>

<bundles_post_ra>
// kernel: tpu_custom_call.1
= control target key start
LH: loop header
LB: loop body
LE: loop exit
PB: predicated region body
PF: predicated region fallthrough
CT: control target
= control target key end

     0   :  { %s943_s0 = inlined_call_operand.hbm [shape: f32[3], index: 0, kind: input, shape index: {}]   ;;  %s944_s1 = inlined_call_operand.vmem [shape: f32[3], index: 1, kind: input, shape index: {}]   ;;  %s945_s2 = inlined_call_operand.hbm [shape: f32[2,3,16,16], index: 2, kind: input, shape index: {}]   ;;  %s946_s3 = inlined_call_operand.hbm [shape: f32[2,3,32,32], index: 3, kind: output, shape index: {}]  }
   0x1   :  { %950 = sst [smem:[#allocation16_spill]] %s943_s0 }
   0x2   :  { %951 = sst [smem:[#allocation17_spill]] %s944_s1 }
   0x3   :  { %8 = vsyncpa [#allocation5], 0 }
   0x4   :  { %9 = vsyncpa [#allocation6], 0 }
   0x5   :  { %10 = vsyncpa [#allocation3], 0 }
   0x6   :  { %12 = vsyncpa [#allocation3 + $0x1], 0 }
   0x7   :  { %13 = vsyncpa [#allocation4], 0 }
   0x8   :  { %15 = vsyncpa [#allocation4 + $0x1], 0  ;;  %s739_s12 = smov 0   ;;  %s741_s13 = smov 0  }
   0x9   :  { %s743_s14 = smov 0   ;;  %s745_s15 = smov 0  }
   0xa   :  { %s747_s16 = smov 0   ;;  %s749_s17 = smov 0  }
   0xb   :  { %s751_s18 = smov 0   ;;  %s753_s19 = smov 0  }
   0xc LB: > { %s437_s20 = sadd.s32 4294967295, %s708_s19   ;;  %s438_s21 = sadd.s32 4294967294, %s708_s19   ;;  %s708_s19 = sphi %s753_s19, %s21_s19   ;;  %s704_s18 = sphi %s751_s18, %s973_s18   ;;  %s700_s17 = sphi %s749_s17, %s972_s17   ;;  %s696_s16 = sphi %s747_s16, %s971_s16   ;;  %s692_s15 = sphi %s745_s15, %s970_s15   ;;  %s688_s14 = sphi %s743_s14, %s969_s14   ;;  %s684_s13 = sphi %s741_s13, %s968_s13   ;;  %s680_s12 = sphi %s739_s12, %s967_s12  }
   0xd   : > { %s33_s22 = sadd.s32 1, %s700_s17  ;;  %s36_s23 = sadd.s32 1, %s704_s18 }
   0xe   : > { %p34_p0 = scmp.ge.s32.totalorder %s33_s22, 3  ;;  %s93_s24 = sadd.s32 1, %s688_s14 }
   0xf   : > { %p100_p1 = scmp.ne.s32.totalorder %s688_s14, %s684_s13  ;;  %p101_p2 = scmp.eq.s32.totalorder %s708_s19, 0 }
  0x10   : > { %s975_s22 = smov (%p34_p0, %s33_s22), 0  ;;  %s977_s23 = smov (!%p34_p0, %s36_s23), %s704_s18 }
  0x11   : > { %952 = sst [smem:[#allocation14_spill]] %s975_s22  ;;  %s87_s25 = ssub.s32 %s700_s17, %s975_s22 }
  0x12   : > { %p792_p3 = por %p101_p2, %p100_p1  ;;  %p38_p4 = scmp.ge.s32.totalorder %s977_s23, 2 }
  0x13   : > { %p106_p5 = scmp.ne.s32.totalorder %s684_s13, %s680_s12  ;;  %p798_p6 = scmp.eq.s32.totalorder %s437_s20, 0 }
  0x14   : > { %p134_p7 = scmp.eq.s32.totalorder %s437_s20, 5  ;;  %s979_s23 = smov (%p38_p4, %s977_s23), 0 }
  0x15   : > { %955 = sst [smem:[#allocation15_spill]] %s979_s23  ;;  %p806_p8 = por %p798_p6, %p106_p5 }
  0x16   : > { %p810_p9 = por %p134_p7, %p100_p1  ;;  %s86_s30 = ssub.s32 %s704_s18, %s979_s23 }
  0x17   : > { %p140_p10 = scmp.eq.s32.totalorder %s438_s21, 5  ;;  %s88_s4 = sor.u32 %s87_s25, %s86_s30 }
  0x18   : > { %s957_s29 = scalar_select %p810_p9, 1, 0 }
  0x19   : > { %p439_p11 = scmp.ge.s32.totalorder %s708_s19, 1  ;;  %p91_p12 = scmp.eq.s32.totalorder %s88_s4, 0 }
  0x1a   : > { %p817_p13 = por %p140_p10, %p106_p5  ;;  %p147_p0 = scmp.lt.s32.totalorder %s708_s19, 7 }
  0x1b   : > { %s823_s6 = scalar_select %p91_p12, %s688_s14, %s93_s24  }
  0x1c   : > { %s958_s5 = scalar_select %p817_p13, 1, 0 }
  0x1d   : > { %p825_p2 = pnand %p439_p11, %p147_p0  ;;  %s960_s1 = sld [smem:[#allocation17_spill]] }
  0x1e   : > { %s710_s20 = smov [#allocation2]   ;;  %s962_s0 = sld [smem:[#allocation16_spill]] }
  0x1f   : > { %p469_p1 = pneg %p825_p2 }
  0x21   : > { %p836_p4 = pnand %p469_p1, %p798_p6 }
  0x23   : > { %s169_s10 = sshll.u32 %s960_s1, 4  ;;  %p569_p7 = pneg %p836_p4  ;;  %s170_s10 = int_to_ptr.vmem [resolvable:$true] %s169_s10 }
  0x24   : > { %472 = dma.hbm_to_smem (!%p836_p4), %s962_s0, 16, %s710_s20, [#allocation5]  }
  0x25   : > { %s567_s25 = scalar_lea.vmem %s170_s10, 16  ;;  %p575_p12 = scmp.lt.s32.totalorder %s170_s10, %s170_s10 }
  0x26   : > { %p568_p5 = scmp.ne.s32.totalorder %s170_s10, %s567_s25  ;;  %p576_p0 = scmp.lt.s32.totalorder %s567_s25, %s567_s25 }
  0x28   : > { %p570_p10 = pnand %p569_p7, %p568_p5  ;;  %p577_p1 = por %p576_p0, %p575_p12 }
  0x2a   : > { %p571_p11 = pneg %p570_p10 }
  0x2c   : > { %p578_p13 = pnand %p577_p1, %p571_p11 }
  0x2e   : > { %581 = shalt.err (!%p578_p13)
}
  0x2f   : > { %s711_s30 = smov [#allocation7]   ;;  %p442_p9 = scmp.ge.s32.totalorder %s708_s19, 6 }
  0x30   : > { %475 = dma.vmem_to_smem (!%p836_p4), %s170_s10, 16, %s711_s30, [#allocation6]  }
  0x31   : > { %176 = sbr.rel (%p442_p9) target bundleno = 74 (0x4a), region = 24 }
  0x36   : > { %179 = sbr.rel (!%p792_p3) target bundleno = 74 (0x4a), region = 28  ;;  %s180_s4 = sand.u32 (%p792_p3), 1, %s688_s14  }
  0x37   : > { %s443_s8 = sshll.u32 (%p792_p3), %s180_s4, 5  ;;  %s181_s9 = scalar_lea.sflag (%p792_p3), [#allocation3], %s180_s4 }
  0x38   : > { %s184_s20 = scalar_lea.vmem (%p792_p3), [#allocation8], %s443_s8 }
  0x3b   : > { %190 = vsyncadd %s181_s9, 256  ;;  %s444_s21 = sshll.u32 %s700_s17, 1  ;;  %s456_s24 = smul.u32 6, %s704_s18 }
  0x3c   : > { %s199_s25 = sshll.u32 %s184_s20, 4  ;;  %s712_s23 = smov [#allocation8]   ;;  %s200_s25 = int_to_ptr.vmem [resolvable:$true] %s199_s25 }
  0x3d   : > { %s195_s0 = sadd.s32 %s456_s24, %s444_s21  ;;  %s592_s26 = scalar_lea.vmem %s200_s25, 256 }
  0x3e   : > { %s445_s10 = sshll.u32 %s195_s0, 7  ;;  %p593_p3 = scmp.ne.s32.totalorder %s200_s25, %s592_s26 }
  0x3f   : > { %s197_s1 = scalar_lea.hbm %s945_s2, %s445_s10  ;;  %s594_s22 = sshll.u32 %s712_s23, 4  ;;  %s595_s22 = int_to_ptr.vmem [resolvable:$false] %s594_s22 }
  0x40   : > { %s596_s4 = scalar_lea.vmem %s595_s22, 1024  ;;  %p597_p9 = scmp.lt.s32.totalorder %s200_s25, %s595_s22 }
  0x41   : > { %p598_p13 = scmp.lt.s32.totalorder %s596_s4, %s592_s26 }
  0x43   : > { %p599_p4 = por %p598_p13, %p597_p9 }
  0x45   : > { %p600_p5 = pnand %p599_p4, %p593_p3 }
  0x47   : > { %603 = shalt.err (!%p600_p5)
}
  0x48   : > { %s713_s8 = smov 128   ;;  %s714_s20 = smov 8  }
  0x49   : > { %205 = dma.hbm_to_vmem [thread:$0]  %s197_s1, 256, %s200_s25, %s181_s9, %s713_s8, %s713_s8, %s714_s20  }
  0x4a PF: > { %211 = sbr.rel (%p825_p2) target bundleno = 116 (0x74), region = 32 }
  0x4f   : > { %663 = dma.done.wait (%p798_p6), [#allocation5], 16  }
  0x50   : > { %665 = vsyncadd (%p798_p6), [#allocation5], 4294967280 }
  0x51   : > { %667 = dma.done.wait (%p798_p6), [#allocation6], 16  }
  0x52   : > { %669 = vsyncadd (%p798_p6), [#allocation6], 4294967280  ;;  %s869_s0 = sand.u32 1, %s684_s13  }
  0x53   : > { %s449_s1 = sshll.u32 %s869_s0, 5  ;;  %s222_s22 = scalar_lea.sflag [#allocation3], %s869_s0 }
  0x54   : > { %s225_s23 = scalar_lea.vmem [#allocation8], %s449_s1 }
  0x55   : > { %671 = dma.done.wait (%p806_p8), %s222_s22, 512  }
  0x56   : > { %673 = vsyncadd (%p806_p8), %s222_s22, 4294966784 }
  0x57   : > { %230 = sfence }
  0x58   : > { %s253_s27 = sld [smem:[#allocation2 + %s692_s15]]  ;;  %vm293_vm0 = vcmask 261120   ;;  %s248_s9 = scalar_lea.vmem [#allocation9], %s449_s1  ;;  %v715_v0 = vmov 0.0   ;;  %v255_v1 = vld [vmem:[%s225_s23] sm:$0xff]  ;;  %v256_v2 = vld [vmem:[%s225_s23 + $0x8] sm:$0xff] }
  0x59   : > { %s254_s7 = sld [smem:[#allocation7 + %s692_s15]]  ;;  %296 = vst.msk [vmem:[%s248_s9 + $0x10] sm:$0xff] %vm293_vm0, %v715_v0  ;;  %297 = vst.msk [vmem:[%s248_s9 + $0x18] sm:$0xff] %vm293_vm0, %v715_v0  ;;  %s452_s21 = sshll.u32 %s692_s15, 2  ;;  %vm269_vm1 = vcmask 130048  }
  0x5a   : > { %s457_s24 = smul.u32 12, %s696_s16  ;;  %s316_s28 = sshll.u32 %s248_s9, 4  ;;  %s883_s28 = int_to_ptr.vmem [resolvable:$true] %s316_s28 }
  0x5b   : > { %s299_s30 = scalar_lea.sflag [#allocation4], %s869_s0  ;;  %s604_s26 = scalar_lea.vmem %s883_s28, 512 }
  0x5c   : > { %s313_s25 = sadd.s32 %s457_s24, %s452_s21  ;;  %p605_p6 = scmp.ne.s32.totalorder %s883_s28, %s604_s26 }
  0x5d   : > { %s453_s10 = sshll.u32 %s313_s25, 7  ;;  %p963_p8 = scmp.ne.s32.totalorder %s957_s29, 0 }
  0x5e   : > { %v259_v3 = vstv %s253_s27  ;;  %s888_s11 = scalar_lea.hbm %s946_s3, %s453_s10  ;;  %s716_s4 = smov [#allocation9]  }
  0x5f   : > { %v260_v4 = vsub.f32 %v255_v1, %v259_v3  ;;  %v264_v5 = vstv %s254_s7  ;;  %v261_v6 = vsub.f32 %v256_v2, %v259_v3  ;;  %p606_p2 = pnand %p605_p6, %p963_p8  ;;  %s608_s8 = sshll.u32 %s716_s4, 4  ;;  %s609_s8 = int_to_ptr.vmem [resolvable:$false] %s608_s8 }
  0x60   : > { %s610_s20 = scalar_lea.vmem %s609_s8, 1024  ;;  %p611_p10 = scmp.lt.s32.totalorder %s883_s28, %s609_s8 }
  0x61   : > { %v265_v7 = vmul.f32 %v264_v5, %v260_v4  ;;  %v266_v8 = vmul.f32 %v264_v5, %v261_v6  ;;  %p607_p7 = pneg %p606_p2  ;;  %p612_p11 = scmp.lt.s32.totalorder %s610_s20, %s604_s26 }
  0x63   : > { %v270_v9 = vsel %vm269_vm1, %v265_v7, 0.0  ;;  %v271_v10 = vsel %vm269_vm1, %v266_v8, 0.0  ;;  %p613_p12 = por %p612_p11, %p611_p10 }
  0x64   : > { %294 = vst.msk [vmem:[%s248_s9] sm:$0xff] %vm293_vm0, %v270_v9  ;;  %295 = vst.msk [vmem:[%s248_s9 + $0x8] sm:$0xff] %vm293_vm0, %v271_v10 }
  0x65   : > { %p614_p0 = pnand %p613_p12, %p607_p7 }
  0x67   : > { %617 = shalt.err (!%p614_p0)
}
  0x68   : > { %s618_s1 = scalar_lea.hbm %s888_s11, 512  ;;  %s622_s27 = scalar_lea.hbm %s946_s3, 3072 }
  0x69   : > { %p619_p1 = scmp.ne.s32.totalorder %s888_s11, %s618_s1  ;;  %p623_p13 = scmp.lt.s32.totalorder %s888_s11, %s946_s3 }
  0x6a   : > { %p624_p4 = scmp.lt.s32.totalorder %s622_s27, %s618_s1 }
  0x6b   : > { %p620_p3 = pnand %p619_p1, %p963_p8 }
  0x6c   : > { %p625_p5 = por %p624_p4, %p623_p13 }
  0x6d   : > { %p621_p9 = pneg %p620_p3 }
  0x6f   : > { %p626_p6 = pnand %p625_p5, %p621_p9 }
  0x71   : > { %629 = shalt.err (!%p626_p6)
}
  0x72   : > { %s717_s21 = smov 128   ;;  %s718_s24 = smov 8  }
  0x73   : > { %467 = dma.vmem_to_hbm [thread:$0]  (%p963_p8), %s883_s28, 512, %s888_s11, %s299_s30, %s717_s21, %s717_s21, %s718_s24  }
  0x74 PF: > { %p484_p2 = scmp.ge.s32.totalorder %s708_s19, 2  ;;  %s331_s25 = sand.u32 1, %s680_s12  }
  0x75   : > { %p964_p7 = scmp.ne.s32.totalorder %s958_s5, 0  ;;  %s332_s10 = scalar_lea.sflag [#allocation4], %s331_s25 }
  0x77   : > { %p477_p10 = pnand %p484_p2, %p964_p7 }
  0x79   : > { %p478_p11 = pneg %p477_p10 }
  0x7b   : > { %675 = dma.done.wait (%p478_p11), %s332_s10, 512  }
  0x7c   : > { %677 = vsyncadd (%p478_p11), %s332_s10, 4294966784  ;;  %s21_s19 = sadd.s32 1, %s708_s19   ;;  %s965_s29 = sld [smem:[#allocation14_spill]] }
  0x7d   : > { %p18_p12 = scmp.ge.s32.totalorder %s21_s19, 8   ;;  %s966_s0 = sld [smem:[#allocation15_spill]] }
  0x7e   : > { %s967_s12 = smov %s684_s13  ;;  %s968_s13 = smov %s688_s14 }
  0x7f   : > { %s969_s14 = smov %s823_s6  ;;  %s970_s15 = smov %s700_s17 }
  0x80   : > { %s971_s16 = smov %s704_s18  ;;  %20 = sbr.rel (!%p18_p12) target bundleno = 12 (0xc), region = 87 }
  0x82   : > { %s972_s17 = smov %s965_s29 }
  0x83   : > { %s973_s18 = smov %s966_s0 }
  0x85   :  { %337 = vsyncpa [#allocation3], 1 }
  0x86   :  { %339 = vsyncpa [#allocation3 + $0x1], 1 }
  0x87   :  { %340 = vsyncpa [#allocation4], 1 }
  0x88   :  { %342 = vsyncpa [#allocation4 + $0x1], 1 }
  0x89   :  { %343 = vsyncpa [#allocation5], 1 }
  0x8a   :  { %345 = vsyncpa [#allocation5 + $0x1], 1 }
  0x8b   :  { %346 = vsyncpa [#allocation6], 1 }
  0x8c   :  { %348 = vsyncpa [#allocation6 + $0x1], 1 }

</bundles_post_ra>
